<compile_context>
chip_gen: v7x
topology: tpu7x:2x2x1
jax: 0.10.0
libtpu: 0.0.40
codegen_flags: <defaults>
</compile_context>

<pallas_src>
import math

import jax
import jax.numpy as jnp
from jax import lax
from jax.experimental import pallas as pl
from jax.experimental.pallas import tpu as pltpu


def _sdpa_kernel(q_ref, k_ref, v_ref, bias_ref, o_ref):
    # q_ref    : (HB, TQ, D)   query tile for a group of HB heads
    # k_ref    : (HB, S, D)    full keys for the same heads
    # v_ref    : (HB, S, D)    full values for the same heads
    # bias_ref : (1, S)        additive mask bias (0 keep / -1e20 drop), f32
    # o_ref    : (TQ, HB * D)  lane-dense output slab (heads concatenated)
    hb, tq, d = q_ref.shape
    scale = jnp.asarray(1.0 / math.sqrt(d), dtype=q_ref.dtype)
    bias = bias_ref[...]  # (1, S), f32; broadcasts over query rows

    cols = []
    for h in range(hb):  # static unroll over the small head group
        q_h = q_ref[h] * scale          # (TQ, D), native dtype (bf16 ok)
        k_h = k_ref[h]                  # (S, D)
        v_h = v_ref[h]                  # (S, D)

        # scores = (q / sqrt(d)) @ k^T, contracting D directly (no k.T copy),
        # f32 accumulation on the MXU.
        s = lax.dot_general(
            q_h, k_h,
            dimension_numbers=(((1,), (1,)), ((), ())),
            preferred_element_type=jnp.float32)      # (TQ, S) f32
        s = s + bias                                 # masked keys -> -1e20

        # Numerically stable softmax over the key axis, kept in f32.
        s_max = jnp.max(s, axis=-1, keepdims=True)
        p = jnp.exp(s - s_max)
        denom = jnp.sum(p, axis=-1, keepdims=True)
        probs = (p * pl.reciprocal(denom, approx=True)).astype(v_h.dtype)

        # attention output for this head: probs @ v, f32 accumulation.
        cols.append(jnp.dot(probs, v_h, preferred_element_type=jnp.float32))

    # Single lane-dense store: (TQ, HB*D) with last dim >= 128.
    o_ref[...] = jnp.concatenate(cols, axis=-1).astype(o_ref.dtype)


def _pick_head_block(n_heads, head_dim):
    # Group enough heads per grid step that the stored tile's last dim
    # (HB * D) reaches the 128-lane width; HB must divide n_heads.
    target = min(n_heads, max(1, -(-128 // head_dim)))
    hb = target
    while n_heads % hb != 0:
        hb -= 1
    return hb


def _pick_q_tile(seq_len):
    # Largest query tile <= 256 that divides S and keeps the sublane dim a
    # multiple of 8 (or is the full S).
    tq = min(seq_len, 256)
    while tq > 1 and (seq_len % tq != 0 or (tq != seq_len and tq % 8 != 0)):
        tq -= 1
    return tq


def scale_dot_product_attention(q, k, v, mask=None):
    """q, k, v: (B, H, S, D).  mask: optional (B, S) (0 = masked out)."""
    B, H, S, D = q.shape

    # Precompute the mask as an additive f32 bias (0 keep / -1e20 drop),
    # broadcast over heads and query rows -- replaces an in-kernel
    # compare+select over the whole score tile with a single add.
    if mask is None:
        bias = jnp.zeros((B, 1, S), dtype=jnp.float32)
    else:
        bias = jnp.where(mask.reshape(B, 1, S) == 0,
                         jnp.float32(-1e20), jnp.float32(0.0))

    HB = _pick_head_block(H, D)   # heads per grid step (lane-dense output)
    G = H // HB                   # head groups
    TQ = _pick_q_tile(S)          # query tile
    NQ = S // TQ

    q_spec = pl.BlockSpec((None, HB, TQ, D), lambda b, g, qi: (b, g, qi, 0))
    kv_spec = pl.BlockSpec((None, HB, S, D), lambda b, g, qi: (b, g, 0, 0))
    bias_spec = pl.BlockSpec((None, 1, S), lambda b, g, qi: (b, 0, 0))
    out_spec = pl.BlockSpec((None, None, TQ, HB * D),
                            lambda b, g, qi: (b, g, qi, 0))

    bytes_per_el = q.dtype.itemsize
    cost = pl.CostEstimate(
        flops=4 * B * H * S * S * D,
        transcendentals=B * H * S * S,
        bytes_accessed=4 * B * H * S * D * bytes_per_el + B * S * 4,
    )

    out = pl.pallas_call(
        _sdpa_kernel,
        out_shape=jax.ShapeDtypeStruct((B, G, S, HB * D), q.dtype),
        grid=(B, G, NQ),
        in_specs=[q_spec, kv_spec, kv_spec, bias_spec],
        out_specs=out_spec,
        compiler_params=pltpu.CompilerParams(
            dimension_semantics=("parallel", "parallel", "parallel"),
            vmem_limit_bytes=64 * 1024 * 1024,
        ),
        cost_estimate=cost,
    )(q, k, v, bias)

    # (B, G, S, HB*D) -> (B, H, S, D): split the concatenated heads and
    # re-interleave into the module's (batch, heads, seq, dim) layout.
    out = out.reshape(B, G, S, HB, D).transpose(0, 1, 3, 2, 4).reshape(B, H, S, D)
    return out


def _reference(q, k, v, mask=None):
    # Pure-JAX reference mirroring the PyTorch forward.
    B, H, S, D = k.shape
    prod = jnp.einsum("bhqd,bhkd->bhqk", q, k) / math.sqrt(D)
    if mask is not None:
        prod = jnp.where(mask[:, None, None, :] == 0, -1e20, prod)
    scores = jax.nn.softmax(prod, axis=-1)
    return jnp.einsum("bhqk,bhkd->bhqd", scores, v)


if __name__ == "__main__":
    B, H, S, D = 2, 4, 8, 32
    key = jax.random.PRNGKey(0)
    kq, kk, kv = jax.random.split(key, 3)
    q = jax.random.normal(kq, (B, H, S, D), dtype=jnp.float32)
    k = jax.random.normal(kk, (B, H, S, D), dtype=jnp.float32)
    v = jax.random.normal(kv, (B, H, S, D), dtype=jnp.float32)
    # mask: last two key positions of batch 1 are masked out.
    mask = jnp.ones((B, S), dtype=jnp.int32).at[1, -2:].set(0)

    out = scale_dot_product_attention(q, k, v, mask)
    jax.block_until_ready(out)

    ref = _reference(q, k, v, mask)
    assert out.shape == (B, H, S, D)
    # approx reciprocal in the softmax denominator -> ~1e-3-level tolerance.
    assert jnp.allclose(out, ref, atol=5e-3, rtol=5e-3)

    # also exercise the unmasked path once
    out_nm = scale_dot_product_attention(q, k, v, None)
    jax.block_until_ready(out_nm)
    ref_nm = _reference(q, k, v, None)
    assert jnp.allclose(out_nm, ref_nm, atol=5e-3, rtol=5e-3)

    print("KERNEL_OK")
</pallas_src>

<mosaic_0001>
module attributes {stable_mosaic.version = 11 : i64} {
  func.func @_sdpa_kernel(%arg0: i32, %arg1: i32, %arg2: i32, %arg3: memref<1x4x8x32xf32, #tpu.memory_space<vmem>>, %arg4: memref<1x4x8x32xf32, #tpu.memory_space<vmem>>, %arg5: memref<1x4x8x32xf32, #tpu.memory_space<vmem>>, %arg6: memref<1x1x8xf32, #tpu.memory_space<vmem>>, %arg7: memref<1x1x8x128xf32, #tpu.memory_space<vmem>>) attributes {dimension_semantics = [#tpu.dimension_semantics<parallel>, #tpu.dimension_semantics<parallel>, #tpu.dimension_semantics<parallel>], iteration_bounds = array<i64: 2, 1, 1>, scalar_prefetch = 0 : i64, scratch_operands = 0 : i64, tpu.core_type = #tpu.core_type<tc>, window_params = [{transform_indices = @transform_0, window_bounds = array<i64: 1, 4, 8, 32>}, {transform_indices = @transform_1, window_bounds = array<i64: 1, 4, 8, 32>}, {transform_indices = @transform_2, window_bounds = array<i64: 1, 4, 8, 32>}, {transform_indices = @transform_3, window_bounds = array<i64: 1, 1, 8>}, {transform_indices = @transform_4, window_bounds = array<i64: 1, 1, 8, 128>}]} {
    %c0 = arith.constant 0 : index
    %c0_0 = arith.constant 0 : index
    %c0_1 = arith.constant 0 : index
    %0 = vector.load %arg6[%c0, %c0_0, %c0_1] : memref<1x1x8xf32, #tpu.memory_space<vmem>>, vector<1x1x8xf32>
    %1 = vector.shape_cast %0 : vector<1x1x8xf32> to vector<1x8xf32>
    %c0_2 = arith.constant 0 : index
    %c0_3 = arith.constant 0 : index
    %c0_4 = arith.constant 0 : index
    %c0_5 = arith.constant 0 : index
    %2 = vector.load %arg3[%c0_2, %c0_3, %c0_4, %c0_5] : memref<1x4x8x32xf32, #tpu.memory_space<vmem>>, vector<1x1x8x32xf32>
    %3 = vector.shape_cast %2 : vector<1x1x8x32xf32> to vector<8x32xf32>
    %cst = arith.constant 0.176776692 : f32
    %4 = vector.broadcast %cst : f32 to vector<8x32xf32>
    %5 = arith.mulf %3, %4 : vector<8x32xf32>
    %c0_6 = arith.constant 0 : index
    %c0_7 = arith.constant 0 : index
    %c0_8 = arith.constant 0 : index
    %c0_9 = arith.constant 0 : index
    %6 = vector.load %arg4[%c0_6, %c0_7, %c0_8, %c0_9] : memref<1x4x8x32xf32, #tpu.memory_space<vmem>>, vector<1x1x8x32xf32>
    %7 = vector.shape_cast %6 : vector<1x1x8x32xf32> to vector<8x32xf32>
    %c0_10 = arith.constant 0 : index
    %c0_11 = arith.constant 0 : index
    %c0_12 = arith.constant 0 : index
    %c0_13 = arith.constant 0 : index
    %8 = vector.load %arg5[%c0_10, %c0_11, %c0_12, %c0_13] : memref<1x4x8x32xf32, #tpu.memory_space<vmem>>, vector<1x1x8x32xf32>
    %9 = vector.shape_cast %8 : vector<1x1x8x32xf32> to vector<8x32xf32>
    %cst_14 = arith.constant dense<0.000000e+00> : vector<8x8xf32>
    %10 = tpu.matmul %5, %7, %cst_14 {dimension_numbers = #tpu.dot_dimension_numbers<[1], [1], [0], [0], [0, 0, 1, 0], [], []>} : vector<8x32xf32>, vector<8x32xf32>, vector<8x8xf32> -> vector<8x8xf32>
    %11 = vector.broadcast %1 : vector<1x8xf32> to vector<8x8xf32>
    %12 = arith.addf %10, %11 : vector<8x8xf32>
    %cst_15 = arith.constant dense<0xFF800000> : vector<8xf32>
    %13 = vector.multi_reduction <maximumf>, %12, %cst_15 [1] : vector<8x8xf32> to vector<8xf32>
    %14 = vector.shape_cast %13 : vector<8xf32> to vector<8x1xf32>
    %15 = vector.broadcast %14 : vector<8x1xf32> to vector<8x8xf32>
    %16 = arith.subf %12, %15 : vector<8x8xf32>
    %17 = math.exp %16 : vector<8x8xf32>
    %cst_16 = arith.constant dense<0.000000e+00> : vector<8xf32>
    %18 = vector.multi_reduction <add>, %17, %cst_16 [1] : vector<8x8xf32> to vector<8xf32>
    %19 = vector.shape_cast %18 : vector<8xf32> to vector<8x1xf32>
    %20 = tpu.reciprocal %19 {approx = true} : vector<8x1xf32> -> vector<8x1xf32>
    %21 = vector.broadcast %20 : vector<8x1xf32> to vector<8x8xf32>
    %22 = arith.mulf %17, %21 : vector<8x8xf32>
    %cst_17 = arith.constant dense<0.000000e+00> : vector<8x32xf32>
    %23 = tpu.matmul %22, %9, %cst_17 {dimension_numbers = #tpu.dot_dimension_numbers<[1], [0], [0], [1], [0, 0, 1, 1], [], []>} : vector<8x8xf32>, vector<8x32xf32>, vector<8x32xf32> -> vector<8x32xf32>
    %c0_18 = arith.constant 0 : index
    %c1 = arith.constant 1 : index
    %c0_19 = arith.constant 0 : index
    %c0_20 = arith.constant 0 : index
    %24 = vector.load %arg3[%c0_18, %c1, %c0_19, %c0_20] : memref<1x4x8x32xf32, #tpu.memory_space<vmem>>, vector<1x1x8x32xf32>
    %25 = vector.shape_cast %24 : vector<1x1x8x32xf32> to vector<8x32xf32>
    %cst_21 = arith.constant 0.176776692 : f32
    %26 = vector.broadcast %cst_21 : f32 to vector<8x32xf32>
    %27 = arith.mulf %25, %26 : vector<8x32xf32>
    %c0_22 = arith.constant 0 : index
    %c1_23 = arith.constant 1 : index
    %c0_24 = arith.constant 0 : index
    %c0_25 = arith.constant 0 : index
    %28 = vector.load %arg4[%c0_22, %c1_23, %c0_24, %c0_25] : memref<1x4x8x32xf32, #tpu.memory_space<vmem>>, vector<1x1x8x32xf32>
    %29 = vector.shape_cast %28 : vector<1x1x8x32xf32> to vector<8x32xf32>
    %c0_26 = arith.constant 0 : index
    %c1_27 = arith.constant 1 : index
    %c0_28 = arith.constant 0 : index
    %c0_29 = arith.constant 0 : index
    %30 = vector.load %arg5[%c0_26, %c1_27, %c0_28, %c0_29] : memref<1x4x8x32xf32, #tpu.memory_space<vmem>>, vector<1x1x8x32xf32>
    %31 = vector.shape_cast %30 : vector<1x1x8x32xf32> to vector<8x32xf32>
    %cst_30 = arith.constant dense<0.000000e+00> : vector<8x8xf32>
    %32 = tpu.matmul %27, %29, %cst_30 {dimension_numbers = #tpu.dot_dimension_numbers<[1], [1], [0], [0], [0, 0, 1, 0], [], []>} : vector<8x32xf32>, vector<8x32xf32>, vector<8x8xf32> -> vector<8x8xf32>
    %33 = vector.broadcast %1 : vector<1x8xf32> to vector<8x8xf32>
    %34 = arith.addf %32, %33 : vector<8x8xf32>
    %cst_31 = arith.constant dense<0xFF800000> : vector<8xf32>
    %35 = vector.multi_reduction <maximumf>, %34, %cst_31 [1] : vector<8x8xf32> to vector<8xf32>
    %36 = vector.shape_cast %35 : vector<8xf32> to vector<8x1xf32>
    %37 = vector.broadcast %36 : vector<8x1xf32> to vector<8x8xf32>
    %38 = arith.subf %34, %37 : vector<8x8xf32>
    %39 = math.exp %38 : vector<8x8xf32>
    %cst_32 = arith.constant dense<0.000000e+00> : vector<8xf32>
    %40 = vector.multi_reduction <add>, %39, %cst_32 [1] : vector<8x8xf32> to vector<8xf32>
    %41 = vector.shape_cast %40 : vector<8xf32> to vector<8x1xf32>
    %42 = tpu.reciprocal %41 {approx = true} : vector<8x1xf32> -> vector<8x1xf32>
    %43 = vector.broadcast %42 : vector<8x1xf32> to vector<8x8xf32>
    %44 = arith.mulf %39, %43 : vector<8x8xf32>
    %cst_33 = arith.constant dense<0.000000e+00> : vector<8x32xf32>
    %45 = tpu.matmul %44, %31, %cst_33 {dimension_numbers = #tpu.dot_dimension_numbers<[1], [0], [0], [1], [0, 0, 1, 1], [], []>} : vector<8x8xf32>, vector<8x32xf32>, vector<8x32xf32> -> vector<8x32xf32>
    %c0_34 = arith.constant 0 : index
    %c2 = arith.constant 2 : index
    %c0_35 = arith.constant 0 : index
    %c0_36 = arith.constant 0 : index
    %46 = vector.load %arg3[%c0_34, %c2, %c0_35, %c0_36] : memref<1x4x8x32xf32, #tpu.memory_space<vmem>>, vector<1x1x8x32xf32>
    %47 = vector.shape_cast %46 : vector<1x1x8x32xf32> to vector<8x32xf32>
    %cst_37 = arith.constant 0.176776692 : f32
    %48 = vector.broadcast %cst_37 : f32 to vector<8x32xf32>
    %49 = arith.mulf %47, %48 : vector<8x32xf32>
    %c0_38 = arith.constant 0 : index
    %c2_39 = arith.constant 2 : index
    %c0_40 = arith.constant 0 : index
    %c0_41 = arith.constant 0 : index
    %50 = vector.load %arg4[%c0_38, %c2_39, %c0_40, %c0_41] : memref<1x4x8x32xf32, #tpu.memory_space<vmem>>, vector<1x1x8x32xf32>
    %51 = vector.shape_cast %50 : vector<1x1x8x32xf32> to vector<8x32xf32>
    %c0_42 = arith.constant 0 : index
    %c2_43 = arith.constant 2 : index
    %c0_44 = arith.constant 0 : index
    %c0_45 = arith.constant 0 : index
    %52 = vector.load %arg5[%c0_42, %c2_43, %c0_44, %c0_45] : memref<1x4x8x32xf32, #tpu.memory_space<vmem>>, vector<1x1x8x32xf32>
    %53 = vector.shape_cast %52 : vector<1x1x8x32xf32> to vector<8x32xf32>
    %cst_46 = arith.constant dense<0.000000e+00> : vector<8x8xf32>
    %54 = tpu.matmul %49, %51, %cst_46 {dimension_numbers = #tpu.dot_dimension_numbers<[1], [1], [0], [0], [0, 0, 1, 0], [], []>} : vector<8x32xf32>, vector<8x32xf32>, vector<8x8xf32> -> vector<8x8xf32>
    %55 = vector.broadcast %1 : vector<1x8xf32> to vector<8x8xf32>
    %56 = arith.addf %54, %55 : vector<8x8xf32>
    %cst_47 = arith.constant dense<0xFF800000> : vector<8xf32>
    %57 = vector.multi_reduction <maximumf>, %56, %cst_47 [1] : vector<8x8xf32> to vector<8xf32>
    %58 = vector.shape_cast %57 : vector<8xf32> to vector<8x1xf32>
    %59 = vector.broadcast %58 : vector<8x1xf32> to vector<8x8xf32>
    %60 = arith.subf %56, %59 : vector<8x8xf32>
    %61 = math.exp %60 : vector<8x8xf32>
    %cst_48 = arith.constant dense<0.000000e+00> : vector<8xf32>
    %62 = vector.multi_reduction <add>, %61, %cst_48 [1] : vector<8x8xf32> to vector<8xf32>
    %63 = vector.shape_cast %62 : vector<8xf32> to vector<8x1xf32>
    %64 = tpu.reciprocal %63 {approx = true} : vector<8x1xf32> -> vector<8x1xf32>
    %65 = vector.broadcast %64 : vector<8x1xf32> to vector<8x8xf32>
    %66 = arith.mulf %61, %65 : vector<8x8xf32>
    %cst_49 = arith.constant dense<0.000000e+00> : vector<8x32xf32>
    %67 = tpu.matmul %66, %53, %cst_49 {dimension_numbers = #tpu.dot_dimension_numbers<[1], [0], [0], [1], [0, 0, 1, 1], [], []>} : vector<8x8xf32>, vector<8x32xf32>, vector<8x32xf32> -> vector<8x32xf32>
    %c0_50 = arith.constant 0 : index
    %c3 = arith.constant 3 : index
    %c0_51 = arith.constant 0 : index
    %c0_52 = arith.constant 0 : index
    %68 = vector.load %arg3[%c0_50, %c3, %c0_51, %c0_52] : memref<1x4x8x32xf32, #tpu.memory_space<vmem>>, vector<1x1x8x32xf32>
    %69 = vector.shape_cast %68 : vector<1x1x8x32xf32> to vector<8x32xf32>
    %cst_53 = arith.constant 0.176776692 : f32
    %70 = vector.broadcast %cst_53 : f32 to vector<8x32xf32>
    %71 = arith.mulf %69, %70 : vector<8x32xf32>
    %c0_54 = arith.constant 0 : index
    %c3_55 = arith.constant 3 : index
    %c0_56 = arith.constant 0 : index
    %c0_57 = arith.constant 0 : index
    %72 = vector.load %arg4[%c0_54, %c3_55, %c0_56, %c0_57] : memref<1x4x8x32xf32, #tpu.memory_space<vmem>>, vector<1x1x8x32xf32>
    %73 = vector.shape_cast %72 : vector<1x1x8x32xf32> to vector<8x32xf32>
    %c0_58 = arith.constant 0 : index
    %c3_59 = arith.constant 3 : index
    %c0_60 = arith.constant 0 : index
    %c0_61 = arith.constant 0 : index
    %74 = vector.load %arg5[%c0_58, %c3_59, %c0_60, %c0_61] : memref<1x4x8x32xf32, #tpu.memory_space<vmem>>, vector<1x1x8x32xf32>
    %75 = vector.shape_cast %74 : vector<1x1x8x32xf32> to vector<8x32xf32>
    %cst_62 = arith.constant dense<0.000000e+00> : vector<8x8xf32>
    %76 = tpu.matmul %71, %73, %cst_62 {dimension_numbers = #tpu.dot_dimension_numbers<[1], [1], [0], [0], [0, 0, 1, 0], [], []>} : vector<8x32xf32>, vector<8x32xf32>, vector<8x8xf32> -> vector<8x8xf32>
    %77 = vector.broadcast %1 : vector<1x8xf32> to vector<8x8xf32>
    %78 = arith.addf %76, %77 : vector<8x8xf32>
    %cst_63 = arith.constant dense<0xFF800000> : vector<8xf32>
    %79 = vector.multi_reduction <maximumf>, %78, %cst_63 [1] : vector<8x8xf32> to vector<8xf32>
    %80 = vector.shape_cast %79 : vector<8xf32> to vector<8x1xf32>
    %81 = vector.broadcast %80 : vector<8x1xf32> to vector<8x8xf32>
    %82 = arith.subf %78, %81 : vector<8x8xf32>
    %83 = math.exp %82 : vector<8x8xf32>
    %cst_64 = arith.constant dense<0.000000e+00> : vector<8xf32>
    %84 = vector.multi_reduction <add>, %83, %cst_64 [1] : vector<8x8xf32> to vector<8xf32>
    %85 = vector.shape_cast %84 : vector<8xf32> to vector<8x1xf32>
    %86 = tpu.reciprocal %85 {approx = true} : vector<8x1xf32> -> vector<8x1xf32>
    %87 = vector.broadcast %86 : vector<8x1xf32> to vector<8x8xf32>
    %88 = arith.mulf %83, %87 : vector<8x8xf32>
    %cst_65 = arith.constant dense<0.000000e+00> : vector<8x32xf32>
    %89 = tpu.matmul %88, %75, %cst_65 {dimension_numbers = #tpu.dot_dimension_numbers<[1], [0], [0], [1], [0, 0, 1, 1], [], []>} : vector<8x8xf32>, vector<8x32xf32>, vector<8x32xf32> -> vector<8x32xf32>
    %90 = tpu.concatenate %23, %45, %67, %89 in 1 : vector<8x32xf32>, vector<8x32xf32>, vector<8x32xf32>, vector<8x32xf32> -> vector<8x128xf32>
    %c0_66 = arith.constant 0 : index
    %c0_67 = arith.constant 0 : index
    %c0_68 = arith.constant 0 : index
    %c0_69 = arith.constant 0 : index
    %91 = vector.load %arg7[%c0_66, %c0_67, %c0_68, %c0_69] : memref<1x1x8x128xf32, #tpu.memory_space<vmem>>, vector<1x1x8x128xf32>
    %92 = vector.shape_cast %91 : vector<1x1x8x128xf32> to vector<8x128xf32>
    %93 = vector.shape_cast %90 : vector<8x128xf32> to vector<1x1x8x128xf32>
    tpu.vector_store %arg7[%c0_66, %c0_67, %c0_68, %c0_69], %93 {strides = array<i32>} : memref<1x1x8x128xf32, #tpu.memory_space<vmem>>, vector<1x1x8x128xf32>,
    return
  }
  func.func @transform_0(%arg0: i32, %arg1: i32, %arg2: i32) -> (i32, i32, i32, i32) {
    %c0_i32 = arith.constant 0 : i32
    %c0_i32_0 = arith.constant 0 : i32
    return %arg0, %arg1, %arg2, %c0_i32 : i32, i32, i32, i32
  }
  func.func @transform_1(%arg0: i32, %arg1: i32, %arg2: i32) -> (i32, i32, i32, i32) {
    %c0_i32 = arith.constant 0 : i32
    %c0_i32_0 = arith.constant 0 : i32
    %c0_i32_1 = arith.constant 0 : i32
    return %arg0, %arg1, %c0_i32, %c0_i32_0 : i32, i32, i32, i32
  }
  func.func @transform_2(%arg0: i32, %arg1: i32, %arg2: i32) -> (i32, i32, i32, i32) {
    %c0_i32 = arith.constant 0 : i32
    %c0_i32_0 = arith.constant 0 : i32
    %c0_i32_1 = arith.constant 0 : i32
    return %arg0, %arg1, %c0_i32, %c0_i32_0 : i32, i32, i32, i32
  }
  func.func @transform_3(%arg0: i32, %arg1: i32, %arg2: i32) -> (i32, i32, i32) {
    %c0_i32 = arith.constant 0 : i32
    %c0_i32_0 = arith.constant 0 : i32
    %c0_i32_1 = arith.constant 0 : i32
    return %arg0, %c0_i32, %c0_i32_0 : i32, i32, i32
  }
  func.func @transform_4(%arg0: i32, %arg1: i32, %arg2: i32) -> (i32, i32, i32, i32) {
    %c0_i32 = arith.constant 0 : i32
    %c0_i32_0 = arith.constant 0 : i32
    return %arg0, %arg1, %arg2, %c0_i32 : i32, i32, i32, i32
  }
}

</mosaic_0001>

<bundles_post_ra>
// kernel: tpu_custom_call.1
= control target key start
LH: loop header
LB: loop body
LE: loop exit
PB: predicated region body
PF: predicated region fallthrough
CT: control target
= control target key end

     0   :  { %s2058_s0 = inlined_call_operand.hbm [shape: f32[2,4,8,32], index: 0, kind: input, shape index: {}]   ;;  %s2059_s1 = inlined_call_operand.hbm [shape: f32[2,4,8,32], index: 1, kind: input, shape index: {}]   ;;  %s2060_s2 = inlined_call_operand.hbm [shape: f32[2,4,8,32], index: 2, kind: input, shape index: {}]   ;;  %s2061_s3 = inlined_call_operand.hbm [shape: f32[2,1,8], index: 3, kind: input, shape index: {}]   ;;  %s2062_s4 = inlined_call_operand.hbm [shape: f32[2,1,8,128], index: 4, kind: output, shape index: {}]  }
   0x1   :  { %2075 = sst [smem:[#allocation20_spill]] %s2059_s1 }
   0x2   :  { %9 = vsyncpa [#allocation3], 0 }
   0x3   :  { %11 = vsyncpa [#allocation3 + $0x1], 0 }
   0x4   :  { %12 = vsyncpa [#allocation6], 0 }
   0x5   :  { %14 = vsyncpa [#allocation6 + $0x1], 0 }
   0x6   :  { %15 = vsyncpa [#allocation9], 0 }
   0x7   :  { %17 = vsyncpa [#allocation9 + $0x1], 0 }
   0x8   :  { %18 = vsyncpa [#allocation4], 0 }
   0x9   :  { %20 = vsyncpa [#allocation4 + $0x1], 0  ;;  %s1685_s15 = smov 0   ;;  %s1687_s16 = smov 0  }
   0xa   :  { %s1689_s17 = smov 0   ;;  %s1691_s18 = smov 0  }
   0xb   :  { %s1693_s19 = smov 0   ;;  %s1695_s20 = smov 0  }
   0xc LB: > { %2076 = sst [smem:[#allocation15_spill]] %s1634_s17  ;;  %s1716_s21 = sadd.s32 4294967295, %s1646_s20   ;;  %s1646_s20 = sphi %s1695_s20, %s26_s20   ;;  %s1642_s19 = sphi %s1693_s19, %s2107_s19   ;;  %s1638_s18 = sphi %s1691_s18, %s2106_s18   ;;  %s1634_s17 = sphi %s1689_s17, %s2102_s17   ;;  %s1630_s16 = sphi %s1687_s16, %s2105_s16   ;;  %s1626_s15 = sphi %s1685_s15, %s2104_s15  }
   0xd   : > { %2077 = sst [smem:[#allocation16_spill]] %s1646_s20  ;;  %s1233_s22 = sadd.s32 4294967294, %s1646_s20  }
   0xe   : > { %s45_s23 = sadd.s32 1, %s1642_s19  ;;  %s56_s24 = sadd.s32 1, %s1634_s17 }
   0xf   : > { %p47_p0 = scmp.ge.s32.totalorder %s45_s23, 2  ;;  %p63_p1 = scmp.ne.s32.totalorder %s1634_s17, %s1630_s16 }
  0x10   : > { %p64_p2 = scmp.eq.s32.totalorder %s1646_s20, 0  ;;  %p69_p3 = scmp.ne.s32.totalorder %s1630_s16, %s1626_s15 }
  0x11   : > { %s2109_s23 = smov (%p47_p0, %s45_s23), 0  ;;  %p70_p5 = scmp.eq.s32.totalorder %s1716_s21, 0 }
  0x12   : > { %2078 = sst [smem:[#allocation17_spill]] %s2109_s23  ;;  %p1728_p4 = por %p64_p2, %p63_p1 }
  0x13   : > { %s49_s26 = ssub.s32 %s1642_s19, %s2109_s23  ;;  %p179_p6 = scmp.eq.s32.totalorder %s1716_s21, 1 }
  0x14   : > { %p54_p7 = scmp.eq.s32.totalorder %s49_s26, 0  ;;  %p1736_p8 = por %p70_p5, %p69_p3 }
  0x15   : > { %p1740_p9 = por %p179_p6, %p63_p1  ;;  %p185_p10 = scmp.eq.s32.totalorder %s1233_s22, 1 }
  0x16   : > { %s2080_s27 = scalar_select %p1736_p8, 1, 0 }
  0x17   : > { %s2081_s28 = scalar_select %p1740_p9, 1, 0 }
  0x18   : > { %s1745_s29 = scalar_select %p54_p7, %s1634_s17, %s56_s24  }
  0x19   : > { %p1747_p11 = por %p185_p10, %p69_p3  ;;  %p1363_p13 = scmp.lt.s32.totalorder %s1646_s20, 2 }
  0x1a   : > { %2082 = sst [smem:[#allocation18_spill]] %s1745_s29  ;;  %s1754_s5 = sand.u32 1, %s1634_s17  }
  0x1b   : > { %s2083_s30 = scalar_select %p1747_p11, 1, 0 }
  0x1c   : > { %s1757_s6 = sshll.u32 %s1754_s5, 5  ;;  %s1760_s7 = sshll.u32 %s1642_s19, 9 }
  0x1d   : > { %2084 = sst [smem:[#allocation19_spill]] %s2083_s30  ;;  %p1764_p0 = pnand %p1363_p13, %p1728_p4 }
  0x1e   : > { %s229_s9 = sand.u32 1, %s1646_s20   ;;  %s2086_s1 = sld [smem:[#allocation20_spill]] }
  0x1f   : > { %s2085_s8 = scalar_select %p1764_p0, 1, 0 }
  0x20   : > { %s233_s13 = scalar_lea.vmem [#allocation5], %s1757_s6  ;;  %s1780_s22 = scalar_lea.sflag [#allocation6], %s229_s9 }
  0x21   : > { %s242_s14 = sshll.u32 %s233_s13, 4  ;;  %p1786_p4 = pneg %p1764_p0  ;;  %s1777_s14 = int_to_ptr.vmem [resolvable:$true] %s242_s14 }
  0x24   : > { %s1773_s12 = scalar_lea.hbm %s2086_s1, %s1760_s7  ;;  %s1441_s11 = scalar_lea.hbm %s2086_s1, 1024 }
  0x25   : > { %s1436_s24 = scalar_lea.hbm %s1773_s12, 512  ;;  %p1442_p7 = scmp.lt.u32.totalorder %s1773_s12, %s2086_s1 }
  0x26   : > { %p1437_p3 = scmp.ne.s32.totalorder %s1773_s12, %s1436_s24  ;;  %p1443_p10 = scmp.lt.u32.totalorder %s1441_s11, %s1436_s24 }
  0x27   : > { %p1445_p12 = scmp.lt.u32.totalorder %s1436_s24, %s1773_s12 }
  0x28   : > { %p1439_p5 = pnand %p1786_p4, %p1437_p3  ;;  %p1444_p13 = por %p1443_p10, %p1442_p7 }
  0x2a   : > { %p1440_p6 = pneg %p1439_p5  ;;  %p1446_p1 = por %p1445_p12, %p1444_p13 }
  0x2c   : > { %p1447_p2 = pnand %p1446_p1, %p1440_p6 }
  0x2e   : > { %1450 = shalt.err (!%p1447_p2)
}
  0x2f   : > { %s1451_s9 = scalar_lea.vmem %s1777_s14, 512  ;;  %s1648_s26 = smov [#allocation5]  }
  0x30   : > { %p1452_p3 = scmp.ne.s32.totalorder %s1777_s14, %s1451_s9  ;;  %s1456_s10 = sshll.u32 %s1648_s26, 4  ;;  %s1457_s10 = int_to_ptr.vmem [resolvable:$false] %s1456_s10 }
  0x31   : > { %s1458_s23 = scalar_lea.vmem %s1457_s10, 1024  ;;  %p1459_p9 = scmp.lt.s32.totalorder %s1777_s14, %s1457_s10 }
  0x32   : > { %p1454_p5 = pnand %p1452_p3, %p1786_p4  ;;  %p1460_p8 = scmp.lt.s32.totalorder %s1458_s23, %s1451_s9 }
  0x34   : > { %p1455_p11 = pneg %p1454_p5  ;;  %p1461_p7 = por %p1460_p8, %p1459_p9 }
  0x36   : > { %p1462_p10 = pnand %p1461_p7, %p1455_p11 }
  0x38   : > { %1465 = shalt.err (!%p1462_p10)
}
  0x39   : > { %s2066_s24 = smov 128   ;;  %s2068_s11 = smov 8  }
  0x3a   : > { %1352 = dma.hbm_to_vmem [thread:$0]  (!%p1764_p0), %s1773_s12, 512, %s1777_s14, %s1780_s22, %s2066_s24, %s2066_s24, %s2068_s11  }
  0x3b   : > { %p2088_p8 = scmp.lt.s32.totalorder %s1646_s20, 3  ;;  %p2089_p9 = scmp.ge.s32.totalorder %s1646_s20, 1 }
  0x3c   : > { %s1825_s10 = scalar_lea.hbm %s2058_s0, %s1760_s7  ;;  %s209_s23 = scalar_lea.vmem [#allocation2], %s1757_s6 }
  0x3d   : > { %p1817_p11 = pnand %p2089_p9, %p2088_p8  ;;  %s219_s1 = sshll.u32 %s209_s23, 4  ;;  %s1828_s1 = int_to_ptr.vmem [resolvable:$true] %s219_s1 }
  0x3e   : > { %s1834_s24 = scalar_lea.hbm %s2060_s2, %s1760_s7  ;;  %s206_s11 = scalar_lea.sflag [#allocation3], %s1754_s5 }
  0x3f   : > { %s2090_s13 = scalar_select %p1817_p11, 1, 0 }
  0x40   : > { %s1466_s29 = scalar_lea.hbm %s1825_s10, 512  ;;  %s1471_s17 = scalar_lea.hbm %s2058_s0, 1024 }
  0x41   : > { %p1467_p12 = scmp.ne.s32.totalorder %s1825_s10, %s1466_s29  ;;  %p1472_p6 = scmp.lt.u32.totalorder %s1825_s10, %s2058_s0 }
  0x42   : > { %p1473_p13 = scmp.lt.u32.totalorder %s1471_s17, %s1466_s29  ;;  %p1475_p5 = scmp.lt.u32.totalorder %s1466_s29, %s1825_s10 }
  0x43   : > { %p1469_p1 = pnand %p1467_p12, %p1786_p4 }
  0x44   : > { %p1474_p3 = por %p1473_p13, %p1472_p6 }
  0x45   : > { %p1470_p2 = pneg %p1469_p1 }
  0x46   : > { %p1476_p7 = por %p1475_p5, %p1474_p3 }
  0x48   : > { %p1477_p10 = pnand %p1476_p7, %p1470_p2 }
  0x4a   : > { %1480 = shalt.err (!%p1477_p10)
}
  0x4b   : > { %s1481_s7 = scalar_lea.vmem %s1828_s1, 512  ;;  %s1651_s23 = smov [#allocation2]  }
  0x4c   : > { %p1482_p8 = scmp.ne.s32.totalorder %s1828_s1, %s1481_s7  ;;  %s1486_s12 = sshll.u32 %s1651_s23, 4  ;;  %s1487_s12 = int_to_ptr.vmem [resolvable:$false] %s1486_s12 }
  0x4d   : > { %s1488_s20 = scalar_lea.vmem %s1487_s12, 1024  ;;  %p1489_p1 = scmp.lt.s32.totalorder %s1828_s1, %s1487_s12 }
  0x4e   : > { %p1484_p9 = pnand %p1482_p8, %p1786_p4  ;;  %p1490_p11 = scmp.lt.s32.totalorder %s1488_s20, %s1481_s7 }
  0x50   : > { %p1485_p12 = pneg %p1484_p9  ;;  %p1491_p6 = por %p1490_p11, %p1489_p1 }
  0x52   : > { %p1492_p13 = pnand %p1491_p6, %p1485_p12 }
  0x54   : > { %1495 = shalt.err (!%p1492_p13)
}
  0x55   : > { %s2091_s17 = smov 8   ;;  %s2092_s29 = smov 128  }
  0x56   : > { %1349 = dma.hbm_to_vmem [thread:$0]  (!%p1764_p0), %s1825_s10, 512, %s1828_s1, %s206_s11, %s2092_s29, %s2092_s29, %s2091_s17  }
  0x57   : > { %s256_s30 = scalar_lea.vmem [#allocation7], %s1757_s6  ;;  %s1496_s9 = scalar_lea.hbm %s1834_s24, 512 }
  0x58   : > { %s265_s14 = sshll.u32 %s256_s30, 4  ;;  %p1497_p11 = scmp.ne.s32.totalorder %s1834_s24, %s1496_s9  ;;  %s1864_s14 = int_to_ptr.vmem [resolvable:$true] %s265_s14 }
  0x59   : > { %s1501_s23 = scalar_lea.hbm %s2060_s2, 1024  ;;  %p1502_p5 = scmp.lt.u32.totalorder %s1834_s24, %s2060_s2 }
  0x5a   : > { %p1499_p2 = pnand %p1497_p11, %p1786_p4  ;;  %p1503_p7 = scmp.lt.u32.totalorder %s1501_s23, %s1496_s9 }
  0x5b   : > { %p1505_p8 = scmp.lt.u32.totalorder %s1496_s9, %s1834_s24 }
  0x5c   : > { %p1500_p3 = pneg %p1499_p2  ;;  %p1504_p10 = por %p1503_p7, %p1502_p5 }
  0x5e   : > { %p1506_p9 = por %p1505_p8, %p1504_p10 }
  0x60   : > { %p1507_p12 = pnand %p1506_p9, %p1500_p3 }
  0x62   : > { %1510 = shalt.err (!%p1507_p12)
}
  0x63   : > { %s1511_s1 = scalar_lea.vmem %s1864_s14, 512  ;;  %s1652_s6 = smov [#allocation7]  }
  0x64   : > { %p1512_p1 = scmp.ne.s32.totalorder %s1864_s14, %s1511_s1  ;;  %s1516_s11 = sshll.u32 %s1652_s6, 4  ;;  %s1517_s11 = int_to_ptr.vmem [resolvable:$false] %s1516_s11 }
  0x65   : > { %s1518_s10 = scalar_lea.vmem %s1517_s11, 1024  ;;  %p1519_p11 = scmp.lt.s32.totalorder %s1864_s14, %s1517_s11 }
  0x66   : > { %p1514_p6 = pnand %p1512_p1, %p1786_p4  ;;  %p1520_p2 = scmp.lt.s32.totalorder %s1518_s10, %s1511_s1 }
  0x68   : > { %p1515_p13 = pneg %p1514_p6  ;;  %p1521_p5 = por %p1520_p2, %p1519_p11 }
  0x6a   : > { %p1522_p7 = pnand %p1521_p5, %p1515_p13 }
  0x6c   : > { %1525 = shalt.err (!%p1522_p7)
}
  0x6d   : > { %1355 = dma.hbm_to_vmem [thread:$0]  (!%p1764_p0), %s1834_s24, 512, %s1864_s14, %s1780_s22, %s2092_s29, %s2092_s29, %s2091_s17  }
  0x6e   : > { %s1245_s30 = sshll.u32 %s1642_s19, 4  ;;  %s278_s9 = scalar_lea.vmem [#allocation8], %s1754_s5 }
  0x6f   : > { %s285_s26 = sshll.u32 %s278_s9, 4  ;;  %s1896_s12 = scalar_lea.hbm %s2061_s3, %s1245_s30  ;;  %s286_s26 = int_to_ptr.vmem [resolvable:$true] %s285_s26 }
  0x70   : > { %s276_s20 = scalar_lea.sflag [#allocation9], %s1754_s5  ;;  %s1526_s1 = scalar_lea.hbm %s1896_s12, 16 }
  0x71   : > { %p1527_p3 = scmp.ne.s32.totalorder %s1896_s12, %s1526_s1  ;;  %s1531_s17 = scalar_lea.hbm %s2061_s3, 32 }
  0x72   : > { %p1532_p9 = scmp.lt.u32.totalorder %s1896_s12, %s2061_s3  ;;  %p1533_p12 = scmp.lt.u32.totalorder %s1531_s17, %s1526_s1 }
  0x73   : > { %p1529_p10 = pnand %p1527_p3, %p1786_p4  ;;  %p1535_p6 = scmp.lt.u32.totalorder %s1526_s1, %s1896_s12 }
  0x74   : > { %p1534_p1 = por %p1533_p12, %p1532_p9 }
  0x75   : > { %p1530_p8 = pneg %p1529_p10 }
  0x76   : > { %p1536_p13 = por %p1535_p6, %p1534_p1 }
  0x78   : > { %p1537_p11 = pnand %p1536_p13, %p1530_p8 }
  0x7a   : > { %1540 = shalt.err (!%p1537_p11)
}
  0x7b   : > { %s1541_s5 = scalar_lea.vmem %s286_s26, 16  ;;  %s1653_s6 = smov [#allocation8]  }
  0x7c   : > { %p1542_p2 = scmp.ne.s32.totalorder %s286_s26, %s1541_s5  ;;  %s1546_s11 = sshll.u32 %s1653_s6, 4  ;;  %s1547_s11 = int_to_ptr.vmem [resolvable:$false] %s1546_s11 }
  0x7d   : > { %s1548_s10 = scalar_lea.vmem %s1547_s11, 32  ;;  %p1549_p3 = scmp.lt.s32.totalorder %s286_s26, %s1547_s11 }
  0x7e   : > { %p1544_p5 = pnand %p1542_p2, %p1786_p4  ;;  %p1550_p10 = scmp.lt.s32.totalorder %s1548_s10, %s1541_s5 }
  0x80   : > { %p1545_p7 = pneg %p1544_p5  ;;  %p1551_p0 = por %p1550_p10, %p1549_p3 }
  0x82   : > { %p1552_p9 = pnand %p1551_p0, %p1545_p7 }
  0x84   : > { %1555 = shalt.err (!%p1552_p9)
}
  0x85   : > { %p2093_p12 = scmp.ne.s32.totalorder %s2085_s8, 0  ;;  %p2094_p8 = scmp.ne.s32.totalorder %s2090_s13, 0 }
  0x86   : > { %s1919_s25 = sand.u32 (!%p2094_p8), 1, %s1630_s16   ;;  %p2095_p4 = scmp.ne.s32.totalorder (!%p2094_p8), %s2080_s27, 0 }
  0x87   : > { %1358 = dma.hbm_to_vmem [thread:$0]  (!%p2093_p12), %s1896_s12, 16, %s286_s26, %s276_s20  }
  0x88   : > { %294 = sbr.rel (%p2094_p8) target bundleno = 1566 (0x61e), region = 36  ;;  %s1247_s30 = sshll.u32 (!%p2094_p8), %s1919_s25, 5 }
  0x89   : > { %s297_s9 = scalar_lea.sflag (!%p2094_p8), [#allocation3], %s1919_s25  ;;  %s1923_s7 = scalar_lea.vmem (!%p2094_p8), [#allocation2], %s1247_s30 }
  0x8f   : > { %1609 = dma.done.wait (%p2095_p4), %s297_s9, 512  }
  0x90   : > { %1611 = vsyncadd (%p2095_p4), %s297_s9, 4294966784  ;;  %s305_s8 = sand.u32 1, %s1716_s21   ;;  %s1930_s26 = scalar_lea.vmem [#allocation5], %s1247_s30 }
  0x91   : > { %s306_s13 = scalar_lea.sflag [#allocation6], %s305_s8 }
  0x92   : > { %1613 = dma.done.wait (%p2095_p4), %s306_s13, 1024  }
  0x93   : > { %1615 = vsyncadd (%p2095_p4), %s306_s13, 4294966272  ;;  %s1936_s23 = scalar_lea.vmem [#allocation7], %s1247_s30  ;;  %s324_s12 = scalar_lea.sflag [#allocation9], %s1919_s25 }
  0x94   : > { %s326_s20 = scalar_lea.vmem [#allocation8], %s1919_s25 }
  0x95   : > { %1617 = dma.done.wait (%p2095_p4), %s324_s12, 16  }
  0x96   : > { %1619 = vsyncadd (%p2095_p4), %s324_s12, 4294967280  ;;  %v1654_v0 = vmov 0.0   ;;  %vm1655_vm0 = vmmov 0   ;;  %vm379_vm1 = vcmask 261120   ;;  %v371_v1 = vld [vmem:[%s1930_s26] sm:$0xff]  ;;  %vm456_vm2 = vcmask 64512  }
  0x97   : > { %1296 = vmatprep.subr.mxu0 %v1654_v0  ;;  %1298 = vmatprep.mubr.msk.f32.mxu0 %vm1655_vm0, %v1654_v0  ;;  %v369_v2 = vld [vmem:[%s1923_s7] sm:$0xff]  ;;  %v1255_v17 = vld [vmem:[%s1923_s7 + $0x8] sm:$0xff]  ;;  %v1261_v21 = vld [vmem:[%s1923_s7 + $0x10] sm:$0xff]  ;;  %s1656_s21 = smov 32   ;;  %s1657_s27 = smov 64   ;;  %vm1055_vm3 = vcmask 523264  }
  0x98   : > { %1301 = vmatprep.subr.mxu1 %v1654_v0  ;;  %1303 = vmatprep.mubr.msk.f32.mxu1 %vm1655_vm0, %v1654_v0  ;;  %v370_v3 = vmul.f32 0.17677669, %v369_v2  ;;  %v1251_v4 = vld [vmem:[%s326_s20] ss:$0 sm:$0xff]  ;;  %v1256_v19 = vld [vmem:[%s1930_s26 + $0x8] sm:$0xff]  ;;  %v1262_v22 = vld [vmem:[%s1930_s26 + $0x10] sm:$0xff] }
  0x99   : > { %1297 = vmatpush3.xpose.msk.msra.mxu0 %vm379_vm1, %v371_v1  ;;  %v372_v14 = vld [vmem:[%s1936_s23] sm:$0xff]  ;;  %v543_v20 = vmul.f32 0.17677669, %v1255_v17  ;;  %v710_v23 = vmul.f32 0.17677669, %v1261_v21  ;;  %v1267_v24 = vld [vmem:[%s1923_s7 + $0x18] sm:$0xff] }
  0x9a   : > { %1311 = vmatprep.subr.mxu0 %v1654_v0  ;;  %1302 = vmatpush3.msra.mxu1 %v372_v14  ;;  %v1268_v25 = vld [vmem:[%s1930_s26 + $0x18] sm:$0xff]  ;;  %v877_v26 = vmul.f32 0.17677669, %v1267_v24  ;;  %v1257_v56 = vld [vmem:[%s1936_s23 + $0x8] sm:$0xff]  ;;  %v1263_v62 = vld [vmem:[%s1936_s23 + $0x10] sm:$0xff]  ;;  %s1658_s1 = smov 96  }
  0x9b   : > { %1306 = vmatprep.subr.mxu1 %v1654_v0  ;;  %v1269_v2 = vld [vmem:[%s1936_s23 + $0x18] sm:$0xff]  ;;  %s1250_s22 = sshll.u32 %s1919_s25, 3  ;;  %s1274_s24 = sshll.u32 %s1638_s18, 7  ;;  %vm1057_vm4 = vcmask 785408  }
  0x9c   : > { %1299 = vmatmul.mubr.msk.f32.vlgmr.msra.gmra.mrb[0].mxu0 %vm379_vm1, %v370_v3  ;;  %s364_s17 = scalar_lea.vmem [#allocation10], %s1250_s22  ;;  %s2009_s6 = scalar_lea.hbm %s2062_s4, %s1274_s24 }
  0x9d   : > { %1313 = vmatprep.mubr.msk.f32.mxu0 %vm1655_vm0, %v1654_v0  ;;  %1312 = vmatpush3.msra.mxu0 %v1257_v56  ;;  %s1076_s29 = sshll.u32 %s364_s17, 4  ;;  %s1061_s18 = scalar_lea.sflag [#allocation4], %s1919_s25  ;;  %s2011_s29 = int_to_ptr.vmem [resolvable:$true] %s1076_s29 }
  0x9e   : > { %1321 = vmatprep.subr.mxu0 %v1654_v0  ;;  %s1556_s11 = scalar_lea.vmem %s2011_s29, 128  ;;  %p2096_p1 = scmp.ne.s32.totalorder %s2081_s28, 0 }
  0x9f   : > { %p1557_p0 = scmp.ne.s32.totalorder %s2011_s29, %s1556_s11  ;;  %s1659_s10 = smov [#allocation10]  }
  0xa0   : > { %s1560_s30 = sshll.u32 %s1659_s10, 4  ;;  %s1561_s30 = int_to_ptr.vmem [resolvable:$false] %s1560_s30 }
  0xa1   : > { %p1558_p6 = pnand %p1557_p0, %p2096_p1  ;;  %s1562_s9 = scalar_lea.vmem %s1561_s30, 256 }
  0xa2   : > { %p1563_p11 = scmp.lt.s32.totalorder %s2011_s29, %s1561_s30  ;;  %p1564_p2 = scmp.lt.s32.totalorder %s1562_s9, %s1556_s11 }
  0xa3   : > { %p1559_p13 = pneg %p1558_p6 }
  0xa4   : > { %p1565_p5 = por %p1564_p2, %p1563_p11 }
  0xa6   : > { %p1566_p7 = pnand %p1565_p5, %p1559_p13 }
 0x16f   : > { %v452_v5 = vpop.f32.mrb[0].mxu0 }
 0x170   : > { %v453_v6 = vadd.f32 %v1251_v4, %v452_v5  ;;  %v1300_v7 = vpop.f32.mrb[1].mxu0 }
 0x172   : > { %v457_v8 = vsel %vm456_vm2, %v453_v6, -inf }
 0x173   : > { %458 = vmax.xlane.f32.xlu0 %v457_v8 }
 0x200   : > { %v459_v9 = vpop.xlane.xlu0 %458 }
 0x201   : > { %v460_v10 = vsub.f32 %v453_v6, %v459_v9 }
 0x203   : > { %v461_v11 = vmul.f32 1.442695, %v460_v10 }
 0x205   : > { %1420 = vpow2.f32 %v461_v11 }
 0x20f   : > { %v1421_v12 = vpop.eup %1420 }
 0x210   : > { %v463_v13 = vsel %vm456_vm2, %v1421_v12, 0.0 }
 0x211   : > { %464 = vadd.xlane.f32.xlu0 %v463_v13 }
 0x29e   : > { %v465_v15 = vpop.xlane.xlu0 %464 }
 0x29f   : > { %1422 = vrcp.f32 %v465_v15 }
 0x2a9   : > { %v1423_v16 = vpop.eup %1422 }
 0x2aa   : > { %v467_v18 = vmul.f32 %v1423_v16, %v1421_v12 }
 0x2ac   : > { %1304 = vmatmul.mubr.msk.f32.vlgmr.msra.gmra.mrb[0].mxu1 %vm456_vm2, %v467_v18 }
 0x2ad   : > { %1307 = vmatpush3.xpose.msk.msra.mxu1 %vm379_vm1, %v1256_v19  ;;  %1308 = vmatprep.mubr.msk.f32.mxu1 %vm1655_vm0, %v1654_v0 }
 0x2ae   : > { %1316 = vmatprep.subr.mxu1 %v1654_v0 }
 0x2b0   : > { %1309 = vmatmul.mubr.msk.f32.vlgmr.msra.gmra.mrb[2].mxu1 %vm379_vm1, %v543_v20 }
 0x2b1   : > { %1317 = vmatpush3.xpose.msk.msra.mxu1 %vm379_vm1, %v1262_v22  ;;  %1318 = vmatprep.mubr.msk.f32.mxu1 %vm1655_vm0, %v1654_v0 }
 0x2b2   : > { %1326 = vmatprep.subr.mxu1 %v1654_v0 }
 0x2b4   : > { %1319 = vmatmul.mubr.msk.f32.vlgmr.msra.gmra.mrb[4].mxu1 %vm379_vm1, %v710_v23 }
 0x2b5   : > { %1327 = vmatpush3.xpose.msk.msra.mxu1 %vm379_vm1, %v1268_v25  ;;  %1328 = vmatprep.mubr.msk.f32.mxu1 %vm1655_vm0, %v1654_v0 }
 0x2b8   : > { %1329 = vmatmul.mubr.msk.f32.vlgmr.msra.gmra.mrb[6].mxu1 %vm379_vm1, %v877_v26 }
 0x37f   : > { %v1982_v27 = vpop.f32.mrb[0].mxu1 }
 0x380   : > { %v1305_v28 = vpop.f32.mrb[1].mxu1 }
 0x383   : > { %v620_v29 = vpop.f32.mrb[2].mxu1 }
 0x384   : > { %v621_v30 = vadd.f32 %v1251_v4, %v620_v29  ;;  %v1310_v31 = vpop.f32.mrb[3].mxu1 }
 0x386   : > { %v624_v32 = vsel %vm456_vm2, %v621_v30, -inf }
 0x387   : > { %625 = vmax.xlane.f32.xlu1 %v624_v32  ;;  %v787_v33 = vpop.f32.mrb[4].mxu1 }
 0x388   : > { %v788_v34 = vadd.f32 %v1251_v4, %v787_v33  ;;  %v1320_v35 = vpop.f32.mrb[5].mxu1 }
 0x38a   : > { %v791_v36 = vsel %vm456_vm2, %v788_v34, -inf }
 0x38b   : > { %792 = vmax.xlane.f32.xlu1 %v791_v36  ;;  %v954_v37 = vpop.f32.mrb[6].mxu1 }
 0x38c   : > { %v955_v38 = vadd.f32 %v1251_v4, %v954_v37  ;;  %v1330_v39 = vpop.f32.mrb[7].mxu1 }
 0x38e   : > { %v958_v40 = vsel %vm456_vm2, %v955_v38, -inf }
 0x38f   : > { %959 = vmax.xlane.f32.xlu0 %v958_v40 }
 0x414   : > { %v626_v41 = vpop.xlane.xlu1 %625 }
 0x415   : > { %v627_v42 = vsub.f32 %v621_v30, %v626_v41 }
 0x417   : > { %v628_v43 = vmul.f32 1.442695, %v627_v42 }
 0x418   : > { %v793_v44 = vpop.xlane.xlu1 %792 }
 0x419   : > { %1424 = vpow2.f32 %v628_v43  ;;  %v794_v45 = vsub.f32 %v788_v34, %v793_v44 }
 0x41b   : > { %v795_v46 = vmul.f32 1.442695, %v794_v45 }
 0x41c   : > { %v960_v47 = vpop.xlane.xlu0 %959 }
 0x41d   : > { %1426 = vpow2.f32 %v795_v46  ;;  %v961_v48 = vsub.f32 %v955_v38, %v960_v47 }
 0x41f   : > { %v962_v49 = vmul.f32 1.442695, %v961_v48 }
 0x421   : > { %1428 = vpow2.f32 %v962_v49 }
 0x423   : > { %v1425_v50 = vpop.eup %1424 }
 0x424   : > { %v630_v51 = vsel %vm456_vm2, %v1425_v50, 0.0 }
 0x425   : > { %631 = vadd.xlane.f32.xlu1 %v630_v51 }
 0x427   : > { %v1427_v52 = vpop.eup %1426 }
 0x428   : > { %v797_v53 = vsel %vm456_vm2, %v1427_v52, 0.0 }
 0x429   : > { %798 = vadd.xlane.f32.xlu0 %v797_v53 }
 0x42b   : > { %v1429_v54 = vpop.eup %1428 }
 0x42c   : > { %v964_v55 = vsel %vm456_vm2, %v1429_v54, 0.0 }
 0x42d   : > { %965 = vadd.xlane.f32.xlu1 %v964_v55 }
 0x4b2   : > { %v632_v57 = vpop.xlane.xlu1 %631 }
 0x4b3   : > { %1430 = vrcp.f32 %v632_v57 }
 0x4b6   : > { %v799_v58 = vpop.xlane.xlu0 %798 }
 0x4b7   : > { %1432 = vrcp.f32 %v799_v58 }
 0x4ba   : > { %v966_v59 = vpop.xlane.xlu1 %965 }
 0x4bb   : > { %1434 = vrcp.f32 %v966_v59 }
 0x4bd   : > { %v1431_v60 = vpop.eup %1430 }
 0x4be   : > { %v634_v61 = vmul.f32 %v1431_v60, %v1425_v50 }
 0x4c0   : > { %1314 = vmatmul.mubr.msk.f32.vlgmr.msra.gmra.mrb[2].mxu0 %vm456_vm2, %v634_v61 }
 0x4c1   : > { %v1433_v63 = vpop.eup %1432  ;;  %1322 = vmatpush3.msra.mxu0 %v1263_v62  ;;  %1323 = vmatprep.mubr.msk.f32.mxu0 %vm1655_vm0, %v1654_v0 }
 0x4c2   : > { %v801_v1 = vmul.f32 %v1433_v63, %v1427_v52  ;;  %1331 = vmatprep.subr.mxu0 %v1654_v0 }
 0x4c4   : > { %1324 = vmatmul.mubr.msk.f32.vlgmr.msra.gmra.mrb[4].mxu0 %vm456_vm2, %v801_v1 }
 0x4c5   : > { %v1435_v3 = vpop.eup %1434  ;;  %1332 = vmatpush3.msra.mxu0 %v1269_v2  ;;  %1333 = vmatprep.mubr.msk.f32.mxu0 %vm1655_vm0, %v1654_v0 }
 0x4c6   : > { %v968_v4 = vmul.f32 %v1435_v3, %v1429_v54 }
 0x4c8   : > { %1334 = vmatmul.mubr.msk.f32.vlgmr.msra.gmra.mrb[6].mxu0 %vm456_vm2, %v968_v4 }
 0x593   : > { %v704_v5 = vpop.f32.mrb[2].mxu0 }
 0x594   : > { %v1315_v6 = vpop.f32.mrb[3].mxu0  ;;  %1043 = vrot.lane.b32.xlu0 %v704_v5, %s1656_s21 }
 0x597   : > { %v871_v7 = vpop.f32.mrb[4].mxu0 }
 0x598   : > { %1047 = vrot.lane.b32.xlu1 %v871_v7, %s1657_s27  ;;  %v1325_v8 = vpop.f32.mrb[5].mxu0 }
 0x59b   : > { %v1038_v9 = vpop.f32.mrb[6].mxu0 }
 0x59c   : > { %1051 = vrot.lane.b32.xlu1 %v1038_v9, %s1658_s1  ;;  %v1335_v10 = vpop.f32.mrb[7].mxu0 }
 0x606   : > { %v1044_v11 = vpop.permute.xlu0 %1043 }
 0x607   : > { %v1054_v12 = vsel %vm379_vm1, %v1982_v27, %v1044_v11 }
 0x60a   : > { %v1048_v0 = vpop.permute.xlu1 %1047 }
 0x60b   : > { %v1056_v13 = vsel %vm1055_vm3, %v1054_v12, %v1048_v0 }
 0x60e   : > { %v1052_v14 = vpop.permute.xlu1 %1051 }
 0x60f   : > { %v1058_v15 = vsel %vm1057_vm4, %v1056_v13, %v1052_v14 }
 0x610   : > { %1059 = vst [vmem:[%s364_s17] sm:$0xff] %v1058_v15 }
 0x611   : > { %1569 = shalt.err (!%p1566_p7)
}
 0x612   : > { %s1570_s25 = scalar_lea.hbm %s2009_s6, 128  ;;  %s1574_s13 = scalar_lea.hbm %s2062_s4, 256 }
 0x613   : > { %p1571_p3 = scmp.ne.s32.totalorder %s2009_s6, %s1570_s25  ;;  %p1575_p12 = scmp.lt.u32.totalorder %s2009_s6, %s2062_s4 }
 0x614   : > { %p1576_p8 = scmp.lt.u32.totalorder %s1574_s13, %s1570_s25  ;;  %p1578_p0 = scmp.lt.u32.totalorder %s1570_s25, %s2009_s6 }
 0x615   : > { %p1572_p10 = pnand %p1571_p3, %p2096_p1 }
 0x616   : > { %p1577_p4 = por %p1576_p8, %p1575_p12 }
 0x617   : > { %p1573_p9 = pneg %p1572_p10 }
 0x618   : > { %p1579_p6 = por %p1578_p0, %p1577_p4 }
 0x61a   : > { %p1580_p13 = pnand %p1579_p6, %p1573_p9 }
 0x61c   : > { %1583 = shalt.err (!%p1580_p13)
}
 0x61d   : > { %1344 = dma.vmem_to_hbm [thread:$0]  (%p2096_p1), %s2011_s29, 128, %s2009_s6, %s1061_s18  }
 0x61e PF: > { %s2097_s12 = sld [smem:[#allocation19_spill]]  ;;  %s2098_s20 = sld [smem:[#allocation16_spill]] }
 0x61f   : > { %s1088_s21 = sand.u32 1, %s1626_s15  }
 0x620   : > { %s1089_s27 = scalar_lea.sflag [#allocation4], %s1088_s21 }
 0x624   : > { %p2099_p11 = scmp.ne.s32.totalorder %s2097_s12, 0  ;;  %p2100_p2 = scmp.ge.s32.totalorder %s2098_s20, 2 }
 0x626   : > { %p1360_p5 = pnand %p2100_p2, %p2099_p11 }
 0x628   : > { %1621 = dma.done.wait (!%p1360_p5), %s1089_s27, 128  }
 0x629   : > { %1623 = vsyncadd (!%p1360_p5), %s1089_s27, 4294967168  ;;  %s26_s20 = sadd.s32 1, %s2098_s20   ;;  %s2101_s1 = sld [smem:[#allocation15_spill]] }
 0x62a   : > { %p23_p7 = scmp.ge.s32.totalorder %s26_s20, 4   ;;  %s2102_s17 = sld [smem:[#allocation18_spill]] }
 0x62b   : > { %s2103_s28 = sld [smem:[#allocation17_spill]]  ;;  %s2104_s15 = smov %s1630_s16 }
 0x62c   : > { %s2106_s18 = smov %s1642_s19  ;;  %25 = sbr.rel (!%p23_p7) target bundleno = 12 (0xc), region = 127 }
 0x62f   : > { %s2105_s16 = smov %s2101_s1 }
 0x631   : > { %s2107_s19 = smov %s2103_s28 }
 0x633   :  { %1094 = vsyncpa [#allocation3], 1 }
 0x634   :  { %1096 = vsyncpa [#allocation3 + $0x1], 1 }
 0x635   :  { %1097 = vsyncpa [#allocation6], 1 }
 0x636   :  { %1099 = vsyncpa [#allocation6 + $0x1], 1 }
 0x637   :  { %1100 = vsyncpa [#allocation9], 1 }
 0x638   :  { %1102 = vsyncpa [#allocation9 + $0x1], 1 }
 0x639   :  { %1103 = vsyncpa [#allocation4], 1 }
 0x63a   :  { %1105 = vsyncpa [#allocation4 + $0x1], 1 }

</bundles_post_ra>
